<compile_context>
chip_gen: v7x
topology: tpu7x:2x2x1
jax: 0.10.0
libtpu: 0.0.40
codegen_flags: <defaults>
</compile_context>

<pallas_src>
import functools

import jax
import jax.numpy as jnp
from jax.experimental import pallas as pl
from jax.experimental.pallas import tpu as pltpu


def _round_up(x, m):
    return ((x + m - 1) // m) * m


def _dice_stats_kernel(x_ref, y_ref, stats_ref, *, ts, spatial, need_mask):
    """Accumulate per-row [sum(p*y), sum(p), sum(y)] over spatial tiles.

    x_ref, y_ref : (TR, TS) logits / targets tile
    stats_ref    : (TR, 3) output accumulator, resident across the spatial axis
    """
    j = pl.program_id(1)  # spatial (reduction) axis, last + "arbitrary"

    @pl.when(j == 0)
    def _init():
        stats_ref[...] = jnp.zeros_like(stats_ref)

    x = x_ref[...].astype(jnp.float32)
    y = y_ref[...].astype(jnp.float32)

    # robust_sigmoid == clamp(sigmoid(x), 0, 1); sigmoid is already in [0, 1],
    # so the clamp is a no-op and dropped (saves VPU ops).
    p = jax.nn.sigmoid(x)

    if need_mask:
        # Zero contributions from out-of-range (padded) spatial columns of the
        # last tile.
        col = j * ts + jax.lax.broadcasted_iota(jnp.int32, x.shape, 1)
        valid = col < spatial
        p = jnp.where(valid, p, 0.0)
        y = jnp.where(valid, y, 0.0)

    tp = jnp.sum(p * y, axis=1, keepdims=True)   # true positives
    sp = jnp.sum(p, axis=1, keepdims=True)       # sum of probabilities
    sy = jnp.sum(y, axis=1, keepdims=True)       # sum of targets

    stats_ref[...] += jnp.concatenate([tp, sp, sy], axis=1)


@functools.partial(jax.jit, static_argnames=("smooth",))
def soft_dice_with_logits_loss(x, y, smooth=1.0):
    """Matches SoftDiceWithLogitsLoss.forward(x, y) (sigmoid nonlinearity,
    no loss_mask): returns the scalar 1 - mean(dice)."""
    assert x.shape == y.shape
    shp = x.shape
    B, C = shp[0], shp[1]
    spatial = 1
    for d in shp[2:]:
        spatial *= d
    BC = B * C

    x2d = x.reshape(BC, spatial).astype(jnp.float32)
    # Targets are one-hot / binary per the nnUNet loss contract; bf16 is exact
    # for {0, 1} and halves y's HBM bytes (mem-bound on v5e/v6e).
    y2d = y.reshape(BC, spatial).astype(jnp.bfloat16)

    # ---- Row (BC) tiling: multiple of 8 (f32 sublane) or the full dim. ----
    # At least two row tiles when BC allows it, so the "parallel" axis can be
    # sharded across v7x's two TensorCores.
    if BC >= 16:
        tr = min(256, max(8, (BC // 2) // 8 * 8))
    else:
        tr = BC
    n_row = pl.cdiv(BC, tr)

    # ---- Spatial tiling: biggest multiple of 128 that fits the VMEM budget
    # of this chip generation (double-buffered x + y inputs). ----
    try:
        vmem_cap = int(pltpu.get_tpu_info().vmem_capacity_bytes)
    except Exception:
        vmem_cap = 64 * 1024 * 1024  # conservative (v7x per-core VMEM)
    input_budget = vmem_cap // 3  # leave room for output/accum + compiler scratch
    bytes_per_col = 2 * tr * (x2d.dtype.itemsize + y2d.dtype.itemsize)  # 2 buffers

    if spatial <= 128:
        ts = spatial  # full-dim block is always legal
    else:
        ts = max(128, (input_budget // bytes_per_col) // 128 * 128)
        ts = min(ts, _round_up(spatial, 128))
    n_col = pl.cdiv(spatial, ts)
    need_mask = (spatial % ts) != 0

    per_step_bytes = 2 * tr * ts * (x2d.dtype.itemsize + y2d.dtype.itemsize)
    # Raise the scoped-VMEM limit above the per-generation defaults so the big
    # tiles actually compile, but stay well under physical capacity.
    vmem_limit = max(32 * 1024 * 1024, per_step_bytes + (4 << 20))
    vmem_limit = int(min(vmem_limit, int(0.75 * vmem_cap)))

    kernel = functools.partial(
        _dice_stats_kernel, ts=ts, spatial=spatial, need_mask=need_mask)

    cost = pl.CostEstimate(
        flops=6 * BC * spatial,
        transcendentals=BC * spatial,  # one sigmoid exp per element
        bytes_accessed=(x2d.size * x2d.dtype.itemsize
                        + y2d.size * y2d.dtype.itemsize
                        + BC * 3 * 4),
    )

    stats = pl.pallas_call(
        kernel,
        out_shape=jax.ShapeDtypeStruct((BC, 3), jnp.float32),
        grid_spec=pltpu.PrefetchScalarGridSpec(
            num_scalar_prefetch=0,
            grid=(n_row, n_col),
            in_specs=[
                pl.BlockSpec((tr, ts), lambda i, j: (i, j)),
                pl.BlockSpec((tr, ts), lambda i, j: (i, j)),
            ],
            out_specs=pl.BlockSpec((tr, 3), lambda i, j: (i, 0)),
        ),
        compiler_params=pltpu.CompilerParams(
            dimension_semantics=("parallel", "arbitrary"),
            vmem_limit_bytes=vmem_limit,
        ),
        cost_estimate=cost,
    )(x2d, y2d)

    tp = stats[:, 0]
    sp = stats[:, 1]  # sum(p)  -> fp = sp - tp
    sy = stats[:, 2]  # sum(y)  -> fn = sy - tp

    nominator = 2.0 * tp + smooth
    # 2*tp + fp + fn + smooth == tp + (sp - tp) + (sy - tp) + 2*tp + smooth
    denominator = sp + sy + smooth
    dc = nominator / (denominator + 1e-8)
    return 1.0 - jnp.mean(dc)


def _reference(x, y, smooth=1.0):
    """Pure-JAX reference mirroring the PyTorch module for a sanity check."""
    p = jnp.clip(jax.nn.sigmoid(x.astype(jnp.float32)), 0.0, 1.0)
    yf = y.astype(jnp.float32)
    axes = tuple(range(2, x.ndim))
    tp = jnp.sum(p * yf, axis=axes)
    fp = jnp.sum(p * (1.0 - yf), axis=axes)
    fn = jnp.sum((1.0 - p) * yf, axis=axes)
    dc = (2.0 * tp + smooth) / (2.0 * tp + fp + fn + smooth + 1e-8)
    return 1.0 - jnp.mean(dc)


if __name__ == "__main__":
    key = jax.random.PRNGKey(0)
    k1, k2 = jax.random.split(key)
    B, C, H, W = 2, 4, 16, 16
    net_output = jax.random.normal(k1, (B, C, H, W), dtype=jnp.float32)
    target = jax.random.bernoulli(k2, 0.4, (B, C, H, W)).astype(jnp.float32)

    loss = soft_dice_with_logits_loss(net_output, target)
    jax.block_until_ready(loss)

    ref = _reference(net_output, target)
    assert jnp.allclose(loss, ref, atol=1e-5, rtol=1e-5), (loss, ref)

    print("KERNEL_OK")
</pallas_src>

<mosaic_0001>
module attributes {stable_mosaic.version = 11 : i64} {
  func.func @_dice_stats_kernel(%arg0: i32, %arg1: i32, %arg2: memref<8x256xf32, #tpu.memory_space<vmem>>, %arg3: memref<8x256xbf16, #tpu.memory_space<vmem>>, %arg4: memref<8x3xf32, #tpu.memory_space<vmem>>) attributes {dimension_semantics = [#tpu.dimension_semantics<parallel>, #tpu.dimension_semantics<arbitrary>], iteration_bounds = array<i64: 1, 1>, scalar_prefetch = 0 : i64, scratch_operands = 0 : i64, tpu.core_type = #tpu.core_type<tc>, window_params = [{transform_indices = @transform_0, window_bounds = array<i64: 8, 256>}, {transform_indices = @transform_1, window_bounds = array<i64: 8, 256>}, {transform_indices = @transform_2, window_bounds = array<i64: 8, 3>}]} {
    %c0_i32 = arith.constant 0 : i32
    %0 = arith.cmpi eq, %arg1, %c0_i32 : i32
    %1 = arith.extui %0 : i1 to i32
    %c0_i32_0 = arith.constant 0 : i32
    %2 = arith.cmpi ne, %1, %c0_i32_0 : i32
    scf.if %2 {
      %cst_11 = arith.constant 0.000000e+00 : f32
      %22 = vector.broadcast %cst_11 : f32 to vector<8x3xf32>
      %c0_12 = arith.constant 0 : index
      %c0_13 = arith.constant 0 : index
      %23 = vector.load %arg4[%c0_12, %c0_13] : memref<8x3xf32, #tpu.memory_space<vmem>>, vector<8x3xf32>
      tpu.vector_store %arg4[%c0_12, %c0_13], %22 {strides = array<i32>} : memref<8x3xf32, #tpu.memory_space<vmem>>, vector<8x3xf32>,
    } else {
    }
    %c0 = arith.constant 0 : index
    %c0_1 = arith.constant 0 : index
    %3 = vector.load %arg2[%c0, %c0_1] : memref<8x256xf32, #tpu.memory_space<vmem>>, vector<8x256xf32>
    %c0_2 = arith.constant 0 : index
    %c0_3 = arith.constant 0 : index
    %4 = vector.load %arg3[%c0_2, %c0_3] : memref<8x256xbf16, #tpu.memory_space<vmem>>, vector<8x256xbf16>
    %5 = arith.extf %4 : vector<8x256xbf16> to vector<8x256xf32>
    %6 = arith.negf %3 : vector<8x256xf32>
    %7 = math.exp %6 : vector<8x256xf32>
    %cst = arith.constant 1.000000e+00 : f32
    %8 = vector.broadcast %cst : f32 to vector<8x256xf32>
    %9 = arith.addf %8, %7 : vector<8x256xf32>
    %10 = arith.divf %8, %9 : vector<8x256xf32>
    %11 = arith.mulf %10, %5 : vector<8x256xf32>
    %cst_4 = arith.constant dense<0.000000e+00> : vector<8xf32>
    %12 = vector.multi_reduction <add>, %11, %cst_4 [1] : vector<8x256xf32> to vector<8xf32>
    %13 = vector.shape_cast %12 : vector<8xf32> to vector<8x1xf32>
    %cst_5 = arith.constant dense<0.000000e+00> : vector<8xf32>
    %14 = vector.multi_reduction <add>, %10, %cst_5 [1] : vector<8x256xf32> to vector<8xf32>
    %15 = vector.shape_cast %14 : vector<8xf32> to vector<8x1xf32>
    %cst_6 = arith.constant dense<0.000000e+00> : vector<8xf32>
    %16 = vector.multi_reduction <add>, %5, %cst_6 [1] : vector<8x256xf32> to vector<8xf32>
    %17 = vector.shape_cast %16 : vector<8xf32> to vector<8x1xf32>
    %c0_7 = arith.constant 0 : index
    %c0_8 = arith.constant 0 : index
    %18 = vector.load %arg4[%c0_7, %c0_8] : memref<8x3xf32, #tpu.memory_space<vmem>>, vector<8x3xf32>
    %19 = tpu.concatenate %13, %15, %17 in 1 : vector<8x1xf32>, vector<8x1xf32>, vector<8x1xf32> -> vector<8x3xf32>
    %20 = arith.addf %18, %19 : vector<8x3xf32>
    %c0_9 = arith.constant 0 : index
    %c0_10 = arith.constant 0 : index
    %21 = vector.load %arg4[%c0_9, %c0_10] : memref<8x3xf32, #tpu.memory_space<vmem>>, vector<8x3xf32>
    tpu.vector_store %arg4[%c0_9, %c0_10], %20 {strides = array<i32>} : memref<8x3xf32, #tpu.memory_space<vmem>>, vector<8x3xf32>,
    return
  }
  func.func @transform_0(%arg0: i32, %arg1: i32) -> (i32, i32) {
    %c0_i32 = arith.constant 0 : i32
    return %arg0, %arg1 : i32, i32
  }
  func.func @transform_1(%arg0: i32, %arg1: i32) -> (i32, i32) {
    %c0_i32 = arith.constant 0 : i32
    return %arg0, %arg1 : i32, i32
  }
  func.func @transform_2(%arg0: i32, %arg1: i32) -> (i32, i32) {
    %c0_i32 = arith.constant 0 : i32
    %c0_i32_0 = arith.constant 0 : i32
    return %arg0, %c0_i32 : i32, i32
  }
}

</mosaic_0001>

<bundles_post_ra>
// kernel: soft_dice_with_logits_loss.1
= control target key start
LH: loop header
LB: loop body
LE: loop exit
PB: predicated region body
PF: predicated region fallthrough
CT: control target
= control target key end

     0   :  { %vm15_vm0 = vcmask 23552   ;;  %v68_v18 = vmov 0.0   ;;  %vm46_vm1 = vcmask 7168   ;;  %vm48_vm2 = vcmask 15360   ;;  %s102_s0 = inlined_call_operand.vmem [shape: f32[8,256], index: 0, kind: input, shape index: {}]   ;;  %s103_s1 = inlined_call_operand.vmem [shape: bf16[8,256], index: 1, kind: input, shape index: {}]   ;;  %s104_s2 = inlined_call_operand.vmem [shape: f32[8,3], index: 2, kind: output, shape index: {}]  }
   0x1   :  { %v17_v0 = vld [vmem:[%s102_s0] sm:$0xff]  ;;  %v18_v1 = vld [vmem:[%s102_s0 + $0x8] sm:$0xff]  ;;  %16 = vst.msk [vmem:[%s104_s2] sm:$0xff] %vm15_vm0, %v68_v18 }
   0x2   :  { %v19_v2 = vld [vmem:[%s103_s1] sm:$0xff]  ;;  %v57_v5 = vmul.f32 -1.442695, %v17_v0  ;;  %v58_v6 = vmul.f32 -1.442695, %v18_v1 }
   0x3   :  { %v20_v3 = vunpack.c.l.bf16 %v19_v2  ;;  %v21_v4 = vunpack.c.h.bf16 %v19_v2 }
   0x4   :  { %60 = vpow2.f32 %v57_v5 }
   0x5   :  { %v42_v7 = vadd.f32 %v21_v4, %v20_v3  ;;  %62 = vpow2.f32 %v58_v6 }
   0x7   :  { %43 = vadd.xlane.f32.xlu1 %v42_v7 }
   0x8   :  { %v45_v22 = vld [vmem:[%s104_s2] sm:$0xff] }
   0xe   :  { %v61_v8 = vpop.eup %60 }
   0xf   :  { %v63_v9 = vpop.eup %62  ;;  %v28_v10 = vadd.f32 1.0, %v61_v8 }
  0x10   :  { %v29_v11 = vadd.f32 1.0, %v63_v9 }
  0x11   :  { %64 = vrcp.f32 %v28_v10 }
  0x12   :  { %66 = vrcp.f32 %v29_v11 }
  0x1b   :  { %v65_v12 = vpop.eup %64 }
  0x1c   :  { %v67_v13 = vpop.eup %66  ;;  %v34_v14 = vmul.f32 %v65_v12, %v20_v3 }
  0x1d   :  { %v35_v15 = vmul.f32 %v67_v13, %v21_v4  ;;  %v39_v17 = vadd.f32 %v67_v13, %v65_v12 }
  0x1f   :  { %v36_v16 = vadd.f32 %v35_v15, %v34_v14 }
  0x21   :  { %37 = vadd.xlane.f32.xlu0 %v36_v16 }
  0x25   :  { %40 = vadd.xlane.f32.xlu0 %v39_v17 }
  0x94   :  { %v44_v20 = vpop.xlane.xlu1 %43 }
  0xae   :  { %v38_v19 = vpop.xlane.xlu0 %37 }
  0xb2   :  { %v41_v21 = vpop.xlane.xlu0 %40 }
  0xb3   :  { %v47_v23 = vsel %vm46_vm1, %v38_v19, %v41_v21 }
  0xb4   :  { %v49_v24 = vsel %vm48_vm2, %v47_v23, %v44_v20 }
  0xb5   :  { %v50_v25 = vadd.f32 %v49_v24, %v45_v22 }
  0xb7   :  { %52 = vst.msk [vmem:[%s104_s2] sm:$0xff] %vm15_vm0, %v50_v25 }

</bundles_post_ra>
